<compile_context>
chip_gen: v6e
topology: v6e:2x2x1
jax: 0.10.0
libtpu: 0.0.40
codegen_flags: <defaults>
</compile_context>

<pallas_src>
import numpy as np

import jax
import jax.numpy as jnp
from jax.experimental import pallas as pl
from jax.experimental.pallas import tpu as pltpu

TAU = 1.0
SUBSTEPS = 16  # RK4 sub-steps folded into each output interval (power of 2)
assert SUBSTEPS & (SUBSTEPS - 1) == 0


def _round_up(x, m):
    return ((x + m - 1) // m) * m


def _segment_propagator(dt, a_t, h_s):
    """Exact RK4^SUBSTEPS propagator over one output interval (row-vector form).

    Returns (P, C) such that  r(t + dt) = r(t) @ P + C,  identical to running
    SUBSTEPS classical RK4 steps for this linear constant-coefficient RHS.
    a_t : (Np, Np)  A^T with A = (W - I)/tau  (zero-padded)
    h_s : (Bp, Np)  h/tau (zero-padded)
    """
    n = a_t.shape[0]
    sdt = dt / SUBSTEPS
    eye = jnp.eye(n, dtype=jnp.float32)
    a1 = a_t
    a2 = jnp.dot(a1, a1, preferred_element_type=jnp.float32)
    a3 = jnp.dot(a2, a1, preferred_element_type=jnp.float32)
    a4 = jnp.dot(a2, a2, preferred_element_type=jnp.float32)
    # One RK4 sub-step:  r <- r @ p + c
    p = (eye + sdt * a1 + (sdt ** 2 / 2.0) * a2
         + (sdt ** 3 / 6.0) * a3 + (sdt ** 4 / 24.0) * a4)
    c = sdt * h_s + jnp.dot(
        h_s,
        (sdt ** 2 / 2.0) * a1 + (sdt ** 3 / 6.0) * a2 + (sdt ** 4 / 24.0) * a3,
        preferred_element_type=jnp.float32)
    # Collapse SUBSTEPS = 2^k sub-steps by repeated squaring:
    #   after m steps:  r -> r @ P_m + c @ S_m,   P_1 = p, S_1 = I
    #   P_{2m} = P_m^2,  S_{2m} = S_m @ P_m + S_m
    s = eye
    for _ in range(SUBSTEPS.bit_length() - 1):
        s = jnp.dot(s, p, preferred_element_type=jnp.float32) + s
        p = jnp.dot(p, p, preferred_element_type=jnp.float32)
    c_total = jnp.dot(c, s, preferred_element_type=jnp.float32)
    return p, c_total


def _ode_step_kernel(p_ref, c_ref, r0_ref, out_ref, r_sc):
    """One grid step = (batch tile b, output time stamp i).

    p_ref  : VMEM (1, Np, Np)  propagator for this stamp (or the uniform one)
    c_ref  : VMEM (1, TB, Np)  accumulated affine term for this stamp
    r0_ref : VMEM (TB, Np)     initial state (batch tile)
    out_ref: VMEM (1, TB, Np)  firing rates at stamp i
    r_sc   : VMEM (TB, Np)     persistent state carry across the time axis
    """
    i = pl.program_id(1)

    @pl.when(i == 0)
    def _():
        r_sc[...] = r0_ref[...]

    @pl.when(i > 0)
    def _():
        r_sc[...] = (
            jnp.dot(r_sc[...], p_ref[0], preferred_element_type=jnp.float32)
            + c_ref[0])

    out_ref[0] = r_sc[...]


def _solve_ode(p_arr, c_arr, r0_p, num_stamps, tb, uniform):
    """Run the Pallas kernel.  r0_p is (Bp, Np); p_arr (Lp,Np,Np); c_arr (Lp,Bp,Np)."""
    Bp, Np = r0_p.shape
    grid_b = Bp // tb

    if uniform:
        p_idx = lambda b, i: (0, 0, 0)   # resident single propagator
        c_idx = lambda b, i: (0, b, 0)
    else:
        p_idx = lambda b, i: (i, 0, 0)   # streamed per-stamp propagator
        c_idx = lambda b, i: (i, b, 0)

    grid_spec = pltpu.PrefetchScalarGridSpec(
        num_scalar_prefetch=0,
        grid=(grid_b, num_stamps),
        in_specs=[
            pl.BlockSpec((1, Np, Np), p_idx),                   # P
            pl.BlockSpec((1, tb, Np), c_idx),                   # C
            pl.BlockSpec((tb, Np), lambda b, i: (b, 0)),        # r0
        ],
        out_specs=pl.BlockSpec((1, tb, Np), lambda b, i: (i, b, 0)),
        scratch_shapes=[pltpu.VMEM((tb, Np), jnp.float32)],     # state carry
    )

    # Explicit scoped-VMEM budget (v5e default is only 16 MiB): P may be
    # double-buffered plus C/r0/out double buffers plus the scratch carry.
    vmem_need = 4 * (2 * Np * Np + 7 * tb * Np)
    vmem_limit = int(min(100 * 2**20, max(32 * 2**20, 2 * vmem_need)))

    return pl.pallas_call(
        _ode_step_kernel,
        out_shape=jax.ShapeDtypeStruct((num_stamps, Bp, Np), jnp.float32),
        grid_spec=grid_spec,
        compiler_params=pltpu.CompilerParams(
            dimension_semantics=("parallel", "arbitrary"),
            vmem_limit_bytes=vmem_limit),
    )(p_arr, c_arr, r0_p)


def multi_dim_model_forward(W_expanded, h, r0, t):
    """JAX/Pallas equivalent of MultiDimModel.forward for non-callable h.

    W_expanded: (*shape, *shape)
    h         : (*batch, *shape)   constant input
    r0        : broadcastable against h (e.g. scalar or (*batch, *shape))
    t         : (L,) time stamps (t[0] is the initial time), or a scalar end
                time (initial time 0).

    Returns (r, t) with r of shape (L, *batch, *shape) (or (*batch, *shape)
    for scalar t).
    """
    W_expanded = jnp.asarray(W_expanded, jnp.float32)
    assert W_expanded.ndim % 2 == 0 and W_expanded.ndim >= 2
    ndim = W_expanded.ndim // 2
    shape = W_expanded.shape[:ndim]
    N = int(np.prod(shape))
    W = W_expanded.reshape(N, N)

    h = jnp.asarray(h, jnp.float32)
    r0 = jnp.asarray(r0, jnp.float32)
    assert h.shape[-ndim:] == shape

    full_shape = jnp.broadcast_shapes(r0.shape, h.shape)
    assert full_shape[-ndim:] == shape
    batch_shape = full_shape[:-ndim]
    B = int(np.prod(batch_shape)) if batch_shape else 1

    h_f = jnp.broadcast_to(h, full_shape).reshape(B, N)
    r0_f = jnp.broadcast_to(r0, full_shape).reshape(B, N)

    # ---- time stamps ----
    t = jnp.asarray(t, jnp.float32)
    scalar_t = (t.ndim == 0)
    t_stamps = jnp.stack([jnp.zeros((), jnp.float32), t]) if scalar_t else t
    assert t_stamps.ndim == 1
    L = int(t_stamps.shape[0])
    dts = t_stamps[1:] - t_stamps[:-1]                         # (L-1,)

    # ---- padding: lanes to a multiple of 128, batch rows to the tile size ----
    Np = max(128, _round_up(N, 128))
    Bp = max(8, _round_up(B, 8))
    if Bp <= 8:
        TB = Bp
    else:
        # At least two batch tiles when Bp >= 16 so v7x megacore has work.
        TB = max(8, min(128, _round_up(Bp // 2, 8)))
        Bp = _round_up(Bp, TB)

    # A = (W - I)/tau so that drdt = A r + h/tau; work with A^T (row vectors).
    a_t = (W.T - jnp.eye(N, dtype=jnp.float32)) / TAU
    a_p = jnp.zeros((Np, Np), jnp.float32).at[:N, :N].set(a_t)
    h_p = jnp.zeros((Bp, Np), jnp.float32).at[:B, :N].set(h_f / TAU)
    r0_p = jnp.zeros((Bp, Np), jnp.float32).at[:B, :N].set(r0_f)

    # ---- per-stamp propagators, hoisted entirely out of the kernel ----
    uniform = True
    dt_u = 0.0
    try:
        dts_np = np.asarray(jax.device_get(dts))
        if dts_np.size > 0:
            uniform = bool(np.allclose(dts_np, dts_np[0], rtol=1e-6, atol=1e-9))
            dt_u = float(dts_np[0])
    except Exception:
        uniform = False  # traced t: stream one propagator per stamp instead

    if uniform:
        p_one, c_one = _segment_propagator(jnp.float32(dt_u), a_p, h_p)
        p_arr, c_arr = p_one[None], c_one[None]                # resident (1, Np, Np)
    else:
        dts_full = jnp.concatenate([jnp.zeros((1,), jnp.float32), dts])
        p_arr, c_arr = jax.vmap(_segment_propagator, in_axes=(0, None, None))(
            dts_full, a_p, h_p)                                # streamed (L, Np, Np)

    out = _solve_ode(p_arr, c_arr, r0_p, L, TB, uniform)       # (L, Bp, Np)
    r = out[:, :B, :N].reshape(L, *batch_shape, *shape)
    if scalar_t:
        return r[-1], t
    return r, t


if __name__ == "__main__":
    key = jax.random.PRNGKey(0)
    k_w, k_h = jax.random.split(key)

    # shape = (4, 16) -> N = 64; W_expanded has shape (4, 16, 4, 16)
    shape = (4, 16)
    N = 4 * 16
    # Deterministic, mildly contractive connectivity so the dynamics are stable.
    W_expanded = (0.5 / N) * jax.random.normal(k_w, (*shape, *shape), jnp.float32)

    batch = (2,)
    h = jax.random.normal(k_h, (*batch, *shape), jnp.float32)  # constant input
    r0 = jnp.float32(0.0)                                      # scalar initial state
    t = jnp.linspace(0.0, 1.0, 8)                              # L = 8 time stamps

    r, t_out = multi_dim_model_forward(W_expanded, h, r0, t)
    r = jax.block_until_ready(r)

    assert r.shape == (t.shape[0], *batch, *shape)
    assert bool(jnp.all(jnp.isfinite(r)))
    print("KERNEL_OK")
</pallas_src>

<mosaic_0001>
module attributes {stable_mosaic.version = 11 : i64} {
  func.func @_ode_step_kernel(%arg0: i32, %arg1: i32, %arg2: memref<1x128x128xf32, #tpu.memory_space<vmem>>, %arg3: memref<1x8x128xf32, #tpu.memory_space<vmem>>, %arg4: memref<8x128xf32, #tpu.memory_space<vmem>>, %arg5: memref<1x8x128xf32, #tpu.memory_space<vmem>>, %arg6: memref<8x128xf32, #tpu.memory_space<vmem>>) attributes {dimension_semantics = [#tpu.dimension_semantics<parallel>, #tpu.dimension_semantics<arbitrary>], iteration_bounds = array<i64: 1, 8>, scalar_prefetch = 0 : i64, scratch_operands = 1 : i64, tpu.core_type = #tpu.core_type<tc>, window_params = [{pipeline_mode = #tpu.pipeline_mode<synchronous>, transform_indices = @transform_0, window_bounds = array<i64: 1, 128, 128>}, {transform_indices = @transform_1, window_bounds = array<i64: 1, 8, 128>}, {transform_indices = @transform_2, window_bounds = array<i64: 8, 128>}, {transform_indices = @transform_3, window_bounds = array<i64: 1, 8, 128>}]} {
    %c0_i32 = arith.constant 0 : i32
    %0 = arith.cmpi eq, %arg1, %c0_i32 : i32
    %1 = arith.extui %0 : i1 to i32
    %c0_i32_0 = arith.constant 0 : i32
    %2 = arith.cmpi ne, %1, %c0_i32_0 : i32
    scf.if %2 {
      %c0_7 = arith.constant 0 : index
      %c0_8 = arith.constant 0 : index
      %10 = vector.load %arg4[%c0_7, %c0_8] : memref<8x128xf32, #tpu.memory_space<vmem>>, vector<8x128xf32>
      %c0_9 = arith.constant 0 : index
      %c0_10 = arith.constant 0 : index
      %11 = vector.load %arg6[%c0_9, %c0_10] : memref<8x128xf32, #tpu.memory_space<vmem>>, vector<8x128xf32>
      tpu.vector_store %arg6[%c0_9, %c0_10], %10 {strides = array<i32>} : memref<8x128xf32, #tpu.memory_space<vmem>>, vector<8x128xf32>,
    } else {
    }
    %c0_i32_1 = arith.constant 0 : i32
    %3 = arith.cmpi sgt, %arg1, %c0_i32_1 : i32
    %4 = arith.extui %3 : i1 to i32
    %c0_i32_2 = arith.constant 0 : i32
    %5 = arith.cmpi ne, %4, %c0_i32_2 : i32
    scf.if %5 {
      %c0_7 = arith.constant 0 : index
      %c0_8 = arith.constant 0 : index
      %10 = vector.load %arg6[%c0_7, %c0_8] : memref<8x128xf32, #tpu.memory_space<vmem>>, vector<8x128xf32>
      %c0_9 = arith.constant 0 : index
      %c0_10 = arith.constant 0 : index
      %c0_11 = arith.constant 0 : index
      %11 = vector.load %arg2[%c0_9, %c0_10, %c0_11] : memref<1x128x128xf32, #tpu.memory_space<vmem>>, vector<1x128x128xf32>
      %12 = vector.shape_cast %11 : vector<1x128x128xf32> to vector<128x128xf32>
      %cst = arith.constant dense<0.000000e+00> : vector<8x128xf32>
      %13 = tpu.matmul %10, %12, %cst {dimension_numbers = #tpu.dot_dimension_numbers<[1], [0], [0], [1], [0, 0, 1, 1], [], []>} : vector<8x128xf32>, vector<128x128xf32>, vector<8x128xf32> -> vector<8x128xf32>
      %c0_12 = arith.constant 0 : index
      %c0_13 = arith.constant 0 : index
      %c0_14 = arith.constant 0 : index
      %14 = vector.load %arg3[%c0_12, %c0_13, %c0_14] : memref<1x8x128xf32, #tpu.memory_space<vmem>>, vector<1x8x128xf32>
      %15 = vector.shape_cast %14 : vector<1x8x128xf32> to vector<8x128xf32>
      %16 = arith.addf %13, %15 : vector<8x128xf32>
      %c0_15 = arith.constant 0 : index
      %c0_16 = arith.constant 0 : index
      %17 = vector.load %arg6[%c0_15, %c0_16] : memref<8x128xf32, #tpu.memory_space<vmem>>, vector<8x128xf32>
      tpu.vector_store %arg6[%c0_15, %c0_16], %16 {strides = array<i32>} : memref<8x128xf32, #tpu.memory_space<vmem>>, vector<8x128xf32>,
    } else {
    }
    %c0 = arith.constant 0 : index
    %c0_3 = arith.constant 0 : index
    %6 = vector.load %arg6[%c0, %c0_3] : memref<8x128xf32, #tpu.memory_space<vmem>>, vector<8x128xf32>
    %c0_4 = arith.constant 0 : index
    %c0_5 = arith.constant 0 : index
    %c0_6 = arith.constant 0 : index
    %7 = vector.load %arg5[%c0_4, %c0_5, %c0_6] : memref<1x8x128xf32, #tpu.memory_space<vmem>>, vector<1x8x128xf32>
    %8 = vector.shape_cast %7 : vector<1x8x128xf32> to vector<8x128xf32>
    %9 = vector.shape_cast %6 : vector<8x128xf32> to vector<1x8x128xf32>
    tpu.vector_store %arg5[%c0_4, %c0_5, %c0_6], %9 {strides = array<i32>} : memref<1x8x128xf32, #tpu.memory_space<vmem>>, vector<1x8x128xf32>,
    return
  }
  func.func @transform_0(%arg0: i32, %arg1: i32) -> (i32, i32, i32) {
    %c0_i32 = arith.constant 0 : i32
    %c0_i32_0 = arith.constant 0 : i32
    %c0_i32_1 = arith.constant 0 : i32
    %c0_i32_2 = arith.constant 0 : i32
    return %c0_i32, %c0_i32_0, %c0_i32_1 : i32, i32, i32
  }
  func.func @transform_1(%arg0: i32, %arg1: i32) -> (i32, i32, i32) {
    %c0_i32 = arith.constant 0 : i32
    %c0_i32_0 = arith.constant 0 : i32
    %c0_i32_1 = arith.constant 0 : i32
    return %c0_i32, %arg0, %c0_i32_0 : i32, i32, i32
  }
  func.func @transform_2(%arg0: i32, %arg1: i32) -> (i32, i32) {
    %c0_i32 = arith.constant 0 : i32
    %c0_i32_0 = arith.constant 0 : i32
    return %arg0, %c0_i32 : i32, i32
  }
  func.func @transform_3(%arg0: i32, %arg1: i32) -> (i32, i32, i32) {
    %c0_i32 = arith.constant 0 : i32
    %c0_i32_0 = arith.constant 0 : i32
    return %arg1, %arg0, %c0_i32 : i32, i32, i32
  }
}

</mosaic_0001>

<bundles_post_ra>
// kernel: tpu_custom_call.1
= control target key start
LH: loop header
LB: loop body
LE: loop exit
PB: predicated region body
PF: predicated region fallthrough
CT: control target
= control target key end

     0   :  { %8 = vsyncpa [#allocation4], 0  ;;  %s934_s0 = inlined_call_operand.hbm [shape: f32[1,128,128], index: 0, kind: input, shape index: {}]   ;;  %s935_s1 = inlined_call_operand.hbm [shape: f32[1,8,128], index: 1, kind: input, shape index: {}]   ;;  %s936_s2 = inlined_call_operand.hbm [shape: f32[8,128], index: 2, kind: input, shape index: {}]   ;;  %s937_s3 = inlined_call_operand.hbm [shape: f32[8,8,128], index: 3, kind: output, shape index: {}]  }
   0x1   :  { %9 = vsyncpa [#allocation7], 0 }
   0x2   :  { %10 = vsyncpa [#allocation5], 0 }
   0x3   :  { %12 = vsyncpa [#allocation5 + $0x1], 0  ;;  %s775_s12 = smov 0   ;;  %s777_s13 = smov 0  }
   0x4   :  { %s779_s14 = smov 0   ;;  %s781_s15 = smov 0  }
   0x5   :  { %s783_s16 = smov 0   ;;  %s785_s17 = smov 0  }
   0x6 LB: > { %s424_s18 = sadd.s32 4294967295, %s745_s17   ;;  %s425_s19 = sadd.s32 4294967294, %s745_s17   ;;  %s745_s17 = sphi %s785_s17, %s18_s17   ;;  %s741_s16 = sphi %s783_s16, %s955_s16   ;;  %s737_s15 = sphi %s781_s15, %s954_s15   ;;  %s733_s14 = sphi %s779_s14, %s953_s14   ;;  %s729_s13 = sphi %s777_s13, %s952_s13   ;;  %s725_s12 = sphi %s775_s12, %s951_s12  }
   0x7   : > { %s27_s20 = sadd.s32 1, %s741_s16  ;;  %s112_s21 = sadd.s32 1, %s733_s14 }
   0x8   : > { %p28_p0 = scmp.ge.s32.totalorder %s27_s20, 8  ;;  %p122_p1 = scmp.ne.s32.totalorder %s733_s14, %s729_s13 }
   0x9   : > { %p123_p2 = scmp.eq.s32.totalorder %s424_s18, 7  ;;  %p128_p3 = scmp.ne.s32.totalorder %s729_s13, %s725_s12 }
   0xa   : > { %s957_s20 = smov (%p28_p0, %s27_s20), 0  ;;  %p129_p5 = scmp.eq.s32.totalorder %s425_s19, 7 }
   0xb   : > { %p815_p4 = por %p123_p2, %p122_p1  ;;  %s107_s23 = ssub.s32 %s741_s16, %s957_s20 }
   0xc   : > { %p426_p6 = scmp.ge.s32.totalorder %s745_s17, 1  ;;  %p110_p7 = scmp.eq.s32.totalorder %s107_s23, 0 }
   0xd   : > { %s942_s22 = scalar_select %p815_p4, 1, 0 }
   0xe   : > { %p822_p8 = por %p129_p5, %p128_p3  ;;  %p136_p9 = scmp.lt.s32.totalorder %s745_s17, 9 }
   0xf   : > { %s828_s25 = scalar_select %p110_p7, %s733_s14, %s112_s21  }
  0x10   : > { %s943_s24 = scalar_select %p822_p8, 1, 0 }
  0x11   : > { %p830_p10 = pnand %p426_p6, %p136_p9  ;;  %p834_p11 = scmp.eq.s32.totalorder %s424_s18, 0 }
  0x12   : > { %s747_s28 = smov [#allocation6]   ;;  %s748_s4 = smov [#allocation3]  }
  0x13   : > { %s944_s26 = scalar_select %p830_p10, 1, 0 }
  0x14   : > { %s945_s27 = scalar_select %p834_p11, 1, 0 }
  0x15   : > { %p507_p12 = pneg %p830_p10  ;;  %s164_s29 = sshll.u32 %s747_s28, 4  ;;  %s165_s29 = int_to_ptr.vmem [resolvable:$true] %s164_s29 }
  0x16   : > { %s148_s5 = sshll.u32 %s748_s4, 4  ;;  %s594_s6 = scalar_lea.vmem %s165_s29, 128  ;;  %s149_s5 = int_to_ptr.vmem [resolvable:$true] %s148_s5 }
  0x17   : > { %p842_p13 = pnand %p834_p11, %p507_p12  ;;  %p595_p1 = scmp.ne.s32.totalorder %s165_s29, %s594_s6 }
  0x18   : > { %p602_p5 = scmp.lt.s32.totalorder %s165_s29, %s165_s29  ;;  %p603_p6 = scmp.lt.s32.totalorder %s594_s6, %s594_s6 }
  0x19   : > { %p585_p0 = pneg %p842_p13 }
  0x1a   : > { %p604_p7 = por %p603_p6, %p602_p5 }
  0x1b   : > { %p597_p2 = pnand %p595_p1, %p585_p0 }
  0x1d   : > { %p598_p3 = pneg %p597_p2 }
  0x1f   : > { %p605_p9 = pnand %p604_p7, %p598_p3 }
  0x21   : > { %608 = shalt.err (!%p605_p9)
}
  0x22   : > { %513 = dma.hbm_to_vmem [thread:$0]  (!%p842_p13), %s935_s1, 128, %s165_s29, [#allocation7]  }
  0x23   : > { %s620_s9 = scalar_lea.vmem %s149_s5, 2048  ;;  %p628_p1 = scmp.lt.s32.totalorder %s149_s5, %s149_s5 }
  0x24   : > { %p621_p12 = scmp.ne.s32.totalorder %s149_s5, %s620_s9  ;;  %p629_p2 = scmp.lt.s32.totalorder %s620_s9, %s620_s9 }
  0x26   : > { %p623_p8 = pnand %p621_p12, %p585_p0  ;;  %p630_p11 = por %p629_p2, %p628_p1 }
  0x28   : > { %p624_p4 = pneg %p623_p8 }
  0x2a   : > { %p631_p10 = pnand %p630_p11, %p624_p4 }
  0x2c   : > { %634 = shalt.err (!%p631_p10)
}
  0x2d   : > { %s749_s10 = smov 128   ;;  %s750_s11 = smov 8  }
  0x2e   : > { %510 = dma.hbm_to_vmem [thread:$0]  (!%p842_p13), %s934_s0, 2048, %s149_s5, [#allocation4], %s749_s10, %s749_s10, %s750_s11  }
  0x2f   : > { %s751_s21 = smov [#allocation8]  }
  0x30   : > { %s177_s23 = sshll.u32 %s751_s21, 4  ;;  %s178_s23 = int_to_ptr.vmem [resolvable:$true] %s177_s23 }
  0x31   : > { %s646_s28 = scalar_lea.vmem %s178_s23, 128  ;;  %p654_p4 = scmp.lt.s32.totalorder %s178_s23, %s178_s23 }
  0x32   : > { %p647_p3 = scmp.ne.s32.totalorder %s178_s23, %s646_s28  ;;  %p655_p10 = scmp.lt.s32.totalorder %s646_s28, %s646_s28 }
  0x34   : > { %p649_p8 = pnand %p647_p3, %p585_p0  ;;  %p656_p11 = por %p655_p10, %p654_p4 }
  0x36   : > { %p650_p5 = pneg %p649_p8 }
  0x38   : > { %p657_p6 = pnand %p656_p11, %p650_p5 }
  0x3a   : > { %660 = shalt.err (!%p657_p6)
}
  0x3b   : > { %516 = dma.hbm_to_vmem [thread:$0]  (!%p842_p13), %s936_s2, 128, %s178_s23, [#allocation7]  }
  0x3c   : > { %p947_p7 = scmp.ne.s32.totalorder %s944_s26, 0 }
  0x3d   : > { %p948_p9 = scmp.ne.s32.totalorder (!%p947_p7), %s945_s27, 0 }
  0x3e   : > { %190 = sbr.rel (%p947_p7) target bundleno = 339 (0x153), region = 32 }
  0x43   : > { %712 = dma.done.wait (%p948_p9), [#allocation4], 2048  }
  0x44   : > { %714 = vsyncadd (%p948_p9), [#allocation4], 4294965248 }
  0x45   : > { %716 = dma.done.wait (%p948_p9), [#allocation7], 256  }
  0x46   : > { %718 = vsyncadd (%p948_p9), [#allocation7], 4294967040  ;;  %s214_s30 = sand.u32 1, %s729_s13   ;;  %p435_p13 = scmp.ne.s32.totalorder %s737_s15, 0 }
  0x47   : > { %s885_s5 = sshll.u32 %s214_s30, 3 }
  0x48   : > { %s216_s26 = scalar_lea.vmem [#allocation9], %s885_s5  ;;  %220 = sbr.rel (%p435_p13) target bundleno = 79 (0x4f), region = 48 }
  0x4d   : > { %v221_v0 = vld [vmem:[#allocation8] sm:$0xff] }
  0x4e   : > { %222 = vst [vmem:[#allocation2] sm:$0xff] %v221_v0 }
  0x4f PF: > { %p436_p0 = scmp.le.s32.totalorder %s737_s15, 0 }
  0x51   : > { %226 = sbr.rel (%p436_p0) target bundleno = 315 (0x13b), region = 52 }
  0x56   : > { %v243_v1 = vld [vmem:[#allocation3 + $0x78] sm:$0xff]  ;;  %v752_v2 = vmov 0.0   ;;  %v242_v3 = vld [vmem:[#allocation3 + $0x70] sm:$0xff]  ;;  %vm753_vm0 = vmmov 0   ;;  %v241_v4 = vld [vmem:[#allocation3 + $0x68] sm:$0xff] }
  0x57   : > { %458 = vmatprep.subr.mxu0 %v752_v2  ;;  %490 = vmatprep.mubr.msk.f32.mxu0 %vm753_vm0, %v752_v2  ;;  %v240_v5 = vld [vmem:[#allocation3 + $0x60] sm:$0xff]  ;;  %v239_v6 = vld [vmem:[#allocation3 + $0x58] sm:$0xff]  ;;  %v238_v7 = vld [vmem:[#allocation3 + $0x50] sm:$0xff] }
  0x58   : > { %459 = vmatpush3.msra.mxu0 %v243_v1  ;;  %v237_v8 = vld [vmem:[#allocation3 + $0x48] sm:$0xff]  ;;  %v236_v9 = vld [vmem:[#allocation3 + $0x40] sm:$0xff]  ;;  %v235_v10 = vld [vmem:[#allocation3 + $0x38] sm:$0xff] }
  0x59   : > { %460 = vmatprep.subr.mxu0 %v752_v2  ;;  %v234_v11 = vld [vmem:[#allocation3 + $0x30] sm:$0xff]  ;;  %v233_v12 = vld [vmem:[#allocation3 + $0x28] sm:$0xff]  ;;  %v232_v13 = vld [vmem:[#allocation3 + $0x20] sm:$0xff] }
  0x5a   : > { %461 = vmatpush3.msra.mxu0 %v242_v3  ;;  %v231_v14 = vld [vmem:[#allocation3 + $0x18] sm:$0xff]  ;;  %v230_v15 = vld [vmem:[#allocation3 + $0x10] sm:$0xff]  ;;  %v229_v16 = vld [vmem:[#allocation3 + $0x8] sm:$0xff] }
  0x5b   : > { %462 = vmatprep.subr.mxu0 %v752_v2  ;;  %v228_v17 = vld [vmem:[#allocation3] sm:$0xff]  ;;  %v227_v18 = vld [vmem:[#allocation2] sm:$0xff] }
  0x5c   : > { %463 = vmatpush3.msra.mxu0 %v241_v4  ;;  %v244_v19 = vld [vmem:[#allocation6] sm:$0xff] }
  0x5d   : > { %464 = vmatprep.subr.mxu0 %v752_v2 }
  0x5e   : > { %465 = vmatpush3.msra.mxu0 %v240_v5 }
  0x5f   : > { %466 = vmatprep.subr.mxu0 %v752_v2 }
  0x60   : > { %467 = vmatpush3.msra.mxu0 %v239_v6 }
  0x61   : > { %468 = vmatprep.subr.mxu0 %v752_v2 }
  0x62   : > { %469 = vmatpush3.msra.mxu0 %v238_v7 }
  0x63   : > { %470 = vmatprep.subr.mxu0 %v752_v2 }
  0x64   : > { %471 = vmatpush3.msra.mxu0 %v237_v8 }
  0x65   : > { %472 = vmatprep.subr.mxu0 %v752_v2 }
  0x66   : > { %473 = vmatpush3.msra.mxu0 %v236_v9 }
  0x67   : > { %474 = vmatprep.subr.mxu0 %v752_v2 }
  0x68   : > { %475 = vmatpush3.msra.mxu0 %v235_v10 }
  0x69   : > { %476 = vmatprep.subr.mxu0 %v752_v2 }
  0x6a   : > { %477 = vmatpush3.msra.mxu0 %v234_v11 }
  0x6b   : > { %478 = vmatprep.subr.mxu0 %v752_v2 }
  0x6c   : > { %479 = vmatpush3.msra.mxu0 %v233_v12 }
  0x6d   : > { %480 = vmatprep.subr.mxu0 %v752_v2 }
  0x6e   : > { %481 = vmatpush3.msra.mxu0 %v232_v13 }
  0x6f   : > { %482 = vmatprep.subr.mxu0 %v752_v2 }
  0x70   : > { %483 = vmatpush3.msra.mxu0 %v231_v14 }
  0x71   : > { %484 = vmatprep.subr.mxu0 %v752_v2 }
  0x72   : > { %485 = vmatpush3.msra.mxu0 %v230_v15 }
  0x73   : > { %486 = vmatprep.subr.mxu0 %v752_v2 }
  0x74   : > { %487 = vmatpush3.msra.mxu0 %v229_v16 }
  0x75   : > { %488 = vmatprep.subr.mxu0 %v752_v2 }
  0x76   : > { %489 = vmatpush3.msra.mxu0 %v228_v17 }
  0x77   : > { %491 = vmatmul.mubr.f32.vlgmr.msra.gmra.mxu0 %v227_v18 }
 0x137   : > { %v311_v20 = vpop.f32.mrf.mxu0 }
 0x138   : > { %v312_v21 = vadd.f32 %v311_v20, %v244_v19 }
 0x139   : > { %v492_v22 = vpop.f32.mrf.mxu0 }
 0x13a   : > { %315 = vst [vmem:[#allocation2] sm:$0xff] %v312_v21 }
 0x13b PF: > { %s438_s27 = sshll.u32 %s737_s15, 7  ;;  %s333_s9 = sshll.u32 %s216_s26, 4  ;;  %s334_s9 = int_to_ptr.vmem [resolvable:$true] %s333_s9 }
 0x13c   : > { %s331_s8 = scalar_lea.hbm %s937_s3, %s438_s27  ;;  %s319_s10 = scalar_lea.sflag [#allocation5], %s214_s30 }
 0x13d   : > { %s661_s11 = scalar_lea.vmem %s334_s9, 128  ;;  %p949_p1 = scmp.ne.s32.totalorder %s942_s22, 0 }
 0x13e   : > { %p662_p12 = scmp.ne.s32.totalorder %s334_s9, %s661_s11  ;;  %s754_s18 = smov [#allocation9]  }
 0x13f   : > { %s665_s19 = sshll.u32 %s754_s18, 4  ;;  %s666_s19 = int_to_ptr.vmem [resolvable:$false] %s665_s19 }
 0x140   : > { %p663_p2 = pnand %p662_p12, %p949_p1  ;;  %s667_s15 = scalar_lea.vmem %s666_s19, 256 }
 0x141   : > { %v316_v23 = vld [vmem:[#allocation2] sm:$0xff]  ;;  %p668_p8 = scmp.lt.s32.totalorder %s334_s9, %s666_s19  ;;  %p669_p5 = scmp.lt.s32.totalorder %s667_s15, %s661_s11 }
 0x142   : > { %317 = vst [vmem:[%s216_s26] sm:$0xff] %v316_v23  ;;  %p664_p3 = pneg %p663_p2 }
 0x143   : > { %p670_p4 = por %p669_p5, %p668_p8 }
 0x145   : > { %p671_p10 = pnand %p670_p4, %p664_p3 }
 0x147   : > { %674 = shalt.err (!%p671_p10)
}
 0x148   : > { %s675_s21 = scalar_lea.hbm %s331_s8, 128  ;;  %s679_s29 = scalar_lea.hbm %s937_s3, 1024 }
 0x149   : > { %p676_p11 = scmp.ne.s32.totalorder %s331_s8, %s675_s21  ;;  %p680_p9 = scmp.lt.s32.totalorder %s331_s8, %s937_s3 }
 0x14a   : > { %p681_p13 = scmp.lt.s32.totalorder %s679_s29, %s675_s21 }
 0x14b   : > { %p677_p6 = pnand %p676_p11, %p949_p1 }
 0x14c   : > { %p682_p0 = por %p681_p13, %p680_p9 }
 0x14d   : > { %p678_p7 = pneg %p677_p6 }
 0x14f   : > { %p683_p12 = pnand %p682_p0, %p678_p7 }
 0x151   : > { %686 = shalt.err (!%p683_p12)
}
 0x152   : > { %505 = dma.vmem_to_hbm [thread:$0]  (%p949_p1), %s334_s9, 128, %s331_s8, %s319_s10  }
 0x153 PF: > { %p527_p2 = scmp.ge.s32.totalorder %s745_s17, 2  ;;  %s345_s5 = sand.u32 1, %s725_s12  }
 0x154   : > { %p950_p3 = scmp.ne.s32.totalorder %s943_s24, 0  ;;  %s346_s26 = scalar_lea.sflag [#allocation5], %s345_s5 }
 0x156   : > { %p518_p8 = pnand %p527_p2, %p950_p3 }
 0x158   : > { %p519_p5 = pneg %p518_p8 }
 0x15a   : > { %720 = dma.done.wait (%p519_p5), %s346_s26, 128  }
 0x15b   : > { %722 = vsyncadd (%p519_p5), %s346_s26, 4294967168  ;;  %s18_s17 = sadd.s32 1, %s745_s17   ;;  %s951_s12 = smov %s729_s13 }
 0x15c   : > { %p15_p4 = scmp.ge.s32.totalorder %s18_s17, 10   ;;  %s952_s13 = smov %s733_s14 }
 0x15d   : > { %s953_s14 = smov %s828_s25  ;;  %s954_s15 = smov %s741_s16 }
 0x15e   : > { %s955_s16 = smov %s957_s20  ;;  %17 = sbr.rel (!%p15_p4) target bundleno = 6 (0x6), region = 87 }
 0x163   :  { %351 = vsyncpa [#allocation4], 1 }
 0x164   :  { %353 = vsyncpa [#allocation4 + $0x1], 1 }
 0x165   :  { %354 = vsyncpa [#allocation7], 1 }
 0x166   :  { %355 = vsyncpa [#allocation5], 1 }
 0x167   :  { %357 = vsyncpa [#allocation5 + $0x1], 1 }

</bundles_post_ra>
